<compile_context>
chip_gen: v7x
topology: tpu7x:2x2x1
jax: 0.10.0
libtpu: 0.0.40
codegen_flags: <defaults>
</compile_context>

<pallas_src>
import functools

import numpy as np
import jax
import jax.numpy as jnp
from jax import lax
from jax.experimental import pallas as pl
from jax.experimental.pallas import tpu as pltpu

_LANE = 128
_DECODE_TS = 512       # max second-minor tile (rows of 128 anchors) for the decode kernel
_IOU_TILE = 1024       # square NMS-mask tile
_IOU_STRIP = 256       # in-kernel row strip (strip-mining of the (T, T) tile)
_IOU_BUCKET = 1024     # K is padded to a multiple of this (compile-cache buckets)


def _pad_to(n, m):
    return ((n + m - 1) // m) * m


# --------------------------------------------------------------------------- #
# Kernel 1: anchor-box decode + clip + min-size mask (dense (TS, 128) tiles)   #
# --------------------------------------------------------------------------- #
def _decode_kernel(anc_ref, pred_ref, roi_ref, mask_ref, *, img_x, img_y, min_size):
    # anc_ref/pred_ref/roi_ref: (4, TS, 128), mask_ref: (1, TS, 128) int8
    anc = anc_ref[...]
    prd = pred_ref[...]
    ax1, ay1, ax2, ay2 = anc[0], anc[1], anc[2], anc[3]          # (TS, 128) each
    dx, dy, dw, dh = prd[0], prd[1], prd[2], prd[3]

    ah = ay2 - ay1
    aw = ax2 - ax1
    acy = ay1 + 0.5 * ah
    acx = ax1 + 0.5 * aw

    cy = dy * ah + acy
    cx = dx * aw + acx
    h = jnp.exp(dh) * ah
    w = jnp.exp(dw) * aw

    x1 = jnp.clip(cx - 0.5 * w, 0.0, img_x)
    y1 = jnp.clip(cy - 0.5 * h, 0.0, img_y)
    x2 = jnp.clip(cx + 0.5 * w, 0.0, img_x)
    y2 = jnp.clip(cy + 0.5 * h, 0.0, img_y)

    # per-coordinate-plane stores: full dense (TS, 128) tiles, unmasked
    roi_ref[0, :, :] = x1
    roi_ref[1, :, :] = y1
    roi_ref[2, :, :] = x2
    roi_ref[3, :, :] = y2

    keep = jnp.logical_and(y2 - y1 >= min_size, x2 - x1 >= min_size)
    mask_ref[0, :, :] = keep.astype(jnp.int8)


@functools.lru_cache(maxsize=None)
def _build_decode_fn(B, S_pad, TS, img_x, img_y, min_size):
    kern = functools.partial(_decode_kernel, img_x=float(img_x), img_y=float(img_y),
                             min_size=float(min_size))
    call = pl.pallas_call(
        kern,
        out_shape=(
            jax.ShapeDtypeStruct((B, 4, S_pad, _LANE), jnp.float32),
            jax.ShapeDtypeStruct((B, 1, S_pad, _LANE), jnp.int8),
        ),
        # anchor-tile outer / batch inner so the anchor block is not re-fetched per image
        grid=(S_pad // TS, B),
        in_specs=[
            pl.BlockSpec((4, TS, _LANE), lambda a, b: (0, a, 0)),
            pl.BlockSpec((None, 4, TS, _LANE), lambda a, b: (b, 0, a, 0)),
        ],
        out_specs=(
            pl.BlockSpec((None, 4, TS, _LANE), lambda a, b: (b, 0, a, 0)),
            pl.BlockSpec((None, 1, TS, _LANE), lambda a, b: (b, 0, a, 0)),
        ),
        compiler_params=pltpu.CompilerParams(
            dimension_semantics=("parallel", "parallel")),
    )
    return jax.jit(call)


def decode_proposals(anchor_boxes, rpn_bbox_pred, img_x, img_y, min_size):
    """anchor_boxes: (A, 4) f32, rpn_bbox_pred: (B, A, 4) f32 -> (roi (B,A,4), valid (B,A))."""
    B, A, _ = rpn_bbox_pred.shape
    S = max(1, -(-A // _LANE))
    TS = min(_pad_to(S, 32), _DECODE_TS)     # multiple of 32 for the int8 mask tile
    S_pad = _pad_to(S, TS)
    A_pad = S_pad * _LANE

    anc = np.zeros((4, A_pad), np.float32)
    anc[:, :A] = np.asarray(anchor_boxes, np.float32).T
    anc = anc.reshape(4, S_pad, _LANE)
    pred = np.zeros((B, 4, A_pad), np.float32)
    pred[:, :, :A] = np.asarray(rpn_bbox_pred, np.float32).transpose(0, 2, 1)
    pred = pred.reshape(B, 4, S_pad, _LANE)

    fn = _build_decode_fn(B, S_pad, TS, float(img_x), float(img_y), float(min_size))
    roi_t, mask_t = fn(jnp.asarray(anc), jnp.asarray(pred))
    roi = np.asarray(roi_t).reshape(B, 4, A_pad)[:, :, :A].transpose(0, 2, 1)   # (B, A, 4)
    valid = np.asarray(mask_t).reshape(B, A_pad)[:, :A] > 0                     # (B, A)
    return roi, valid


# --------------------------------------------------------------------------- #
# Kernel 2: strictly-upper thresholded pairwise-IoU mask (strip-mined tiles)   #
# --------------------------------------------------------------------------- #
def _iou_hits_kernel(rows_ref, cols_ref, out_ref, *, scale, tile, strip):
    # rows_ref: (T, 4), cols_ref: (4, T), out_ref: (T, T) int8 (strict upper triangle)
    i = pl.program_id(0)
    j = pl.program_id(1)

    @pl.when(j < i)
    def _():
        out_ref[...] = jnp.zeros_like(out_ref)

    @pl.when(j >= i)
    def _():
        cols = cols_ref[...]                       # (4, T)
        cx1 = cols[0:1, :]
        cy1 = cols[1:2, :]
        cx2 = cols[2:3, :]
        cy2 = cols[3:4, :]
        # scaled column areas, scale = thresh / (1 + thresh)
        sc = scale * (cx2 - cx1 + 1.0) * (cy2 - cy1 + 1.0)                 # (1, T)
        col_idx = j * tile + lax.broadcasted_iota(jnp.int32, (1, tile), 1)  # (1, T)

        @pl.loop(0, tile // strip)
        def _(sdx):
            r0 = pl.multiple_of(sdx * strip, strip)
            rows = rows_ref[pl.ds(r0, strip), :]                           # (strip, 4)
            rx1 = rows[:, 0:1]
            ry1 = rows[:, 1:2]
            rx2 = rows[:, 2:3]
            ry2 = rows[:, 3:4]
            sr = scale * (rx2 - rx1 + 1.0) * (ry2 - ry1 + 1.0)             # (strip, 1)
            row_idx = (i * tile + r0
                       + lax.broadcasted_iota(jnp.int32, (strip, 1), 0))   # (strip, 1)

            xx1 = jnp.maximum(rx1, cx1)                                    # (strip, T)
            yy1 = jnp.maximum(ry1, cy1)
            xx2 = jnp.minimum(rx2, cx2)
            yy2 = jnp.minimum(ry2, cy2)
            w = jnp.maximum(xx2 - xx1 + 1.0, 0.0)
            h = jnp.maximum(yy2 - yy1 + 1.0, 0.0)
            inter = w * h
            # division-free, union-free threshold test:
            #   inter/union >= t  <=>  inter >= (t/(1+t)) * (area_r + area_c)
            hit = jnp.logical_and(inter >= sr + sc, col_idx > row_idx)
            out_ref[pl.ds(r0, strip), :] = hit.astype(jnp.int8)


@functools.lru_cache(maxsize=None)
def _build_nms_offsets_fn(N, thresh):
    tile, strip = _IOU_TILE, _IOU_STRIP
    n_blk = N // tile
    scale = float(thresh) / (1.0 + float(thresh))
    kern = functools.partial(_iou_hits_kernel, scale=scale, tile=tile, strip=strip)

    mask_call = pl.pallas_call(
        kern,
        out_shape=jax.ShapeDtypeStruct((N, N), jnp.int8),
        grid=(n_blk, n_blk),
        in_specs=[
            pl.BlockSpec((tile, 4), lambda i, j: (i, 0)),
            pl.BlockSpec((4, tile), lambda i, j: (0, j)),
        ],
        out_specs=pl.BlockSpec((tile, tile), lambda i, j: (i, j)),
        compiler_params=pltpu.CompilerParams(
            dimension_semantics=("parallel", "parallel"),
            vmem_limit_bytes=48 * 1024 * 1024),
    )

    def run(boxes):                                # boxes: (N, 4) f32
        mask = mask_call(boxes, boxes.T)           # (N, N) int8, strictly upper triangular
        # Diagonal reduction stays on device: column k (k >= 1) of the row-major
        # (N, N+1) view of the zero-padded flat mask is exactly the k-th superdiagonal
        # (lower-triangle entries that alias into it are zero by construction).
        flat = jnp.concatenate([mask.reshape(-1), jnp.zeros((N,), jnp.int8)])
        return jnp.max(flat.reshape(N, N + 1), axis=0)     # (N+1,) int8; d = k - 1

    return jax.jit(run)


def launch_nms_offset_hits(boxes_np, thresh):
    """boxes_np: (K, 4) f32.  Returns an (N+1,) int8 DEVICE array (asynchronous launch):
    entry k >= 1 is nonzero iff some pair (z, z+k) has IoU >= thresh, i.e. offset d = k-1."""
    K = boxes_np.shape[0]
    N = max(_pad_to(K, _IOU_BUCKET), _IOU_BUCKET)
    boxes = np.empty((N, 4), np.float32)
    boxes[:K] = boxes_np
    if N > K:
        # far-away degenerate padding boxes: never overlap anything (incl. each other)
        far = 1e6 + 10.0 * np.arange(N - K, dtype=np.float32)
        boxes[K:, 0] = far
        boxes[K:, 1] = far
        boxes[K:, 2] = far
        boxes[K:, 3] = far
    fn = _build_nms_offsets_fn(N, float(thresh))
    return fn(jnp.asarray(boxes))


def nms_removed_offsets(boxes_np, thresh):
    """Blocking convenience wrapper: unique offsets d = j - z - 1 with IoU(z, j) >= thresh."""
    hits = np.asarray(launch_nms_offset_hits(boxes_np, thresh))
    return np.nonzero(hits[1:])[0]


# --------------------------------------------------------------------------- #
# ProposalLayer                                                                #
# --------------------------------------------------------------------------- #
class Anchor:
    def __init__(self, anchor_boxes):
        self.anchor_boxes = anchor_boxes


class ProposalLayerPallas:
    def __init__(self, image_size=(1333, 402), min_size=16, nms_thresh=0.7,
                 n_train_pre_nms=12000, n_train_post_nms=2000):
        self.NMS_thresh = nms_thresh
        self.n_train_pre_nms = n_train_pre_nms
        self.n_train_post_nms = n_train_post_nms
        self.image_size = image_size
        self.min_size = min_size

    def __call__(self, anchor, rpn_cls_score, rpn_bbox_pred,
                 rpn_cls_loss=None, rpn_bbox_loss=None, image=None):
        rpn_cls_score = np.asarray(rpn_cls_score, np.float32)
        rpn_bbox_pred_np = np.asarray(rpn_bbox_pred, np.float32)
        anchor_boxes = np.asarray(anchor.anchor_boxes, np.float32)

        batch_size = rpn_cls_score.shape[0]
        H = int(self.image_size[0] / self.min_size)
        W = int(self.image_size[1] / self.min_size)

        # objectness (fg) score extraction -- glue reshape / slice
        objectness_score = rpn_cls_score.reshape(
            batch_size, H, W, 9, 2)[:, :, :, :, 1].reshape(batch_size, -1)

        # Pallas kernel 1: decode + clip + min-size mask
        roi, valid = decode_proposals(anchor_boxes, rpn_bbox_pred_np,
                                      self.image_size[0], self.image_size[1],
                                      self.min_size)

        # Phase 1: host pre-NMS selection + asynchronous kernel launches for every image.
        staged = []
        for i in range(batch_size):
            keep = np.where(valid[i])[0]
            _roi = roi[i, keep, :]
            score = objectness_score[i, keep]
            order = score.ravel().argsort()[::-1][: self.n_train_pre_nms]
            _roi = _roi[order, :]
            hits_dev = None
            if _roi.shape[0] > 1:
                # Pallas kernel 2 + on-device diagonal reduction (the O(K^2) hot path)
                hits_dev = launch_nms_offset_hits(_roi, self.NMS_thresh)
            staged.append((_roi, hits_dev))

        # Phase 2: host bookkeeping, overlapped with later images' device work / D2H.
        # TODO(synk): the dynamic-shape NMS bookkeeping (data-dependent index sets,
        # np.unique / np.delete, variable-length per-batch outputs) has no static-shape
        # Pallas equivalent; it stays on host and reproduces the reference exactly,
        # including its slice-relative index convention (inds from row z are j - z - 1).
        batch_roi = []
        for _roi, hits_dev in staged:
            if hits_dev is not None:
                hits = np.asarray(hits_dev)          # tiny O(K) transfer
                inds = np.nonzero(hits[1:])[0]
                if inds.size > 0:
                    _roi = np.delete(_roi, inds, 0)
            batch_roi.append(_roi[: self.n_train_post_nms])
        return batch_roi


# --------------------------------------------------------------------------- #
# numpy references (correctness spot-checks)                                   #
# --------------------------------------------------------------------------- #
def _decode_reference_np(anchor_boxes, pred, img_x, img_y):
    ah = anchor_boxes[:, 3] - anchor_boxes[:, 1]
    aw = anchor_boxes[:, 2] - anchor_boxes[:, 0]
    acy = anchor_boxes[:, 1] + 0.5 * ah
    acx = anchor_boxes[:, 0] + 0.5 * aw
    dy = pred[:, :, 1::4]
    dx = pred[:, :, 0::4]
    dh = pred[:, :, 3::4]
    dw = pred[:, :, 2::4]
    cy = dy * ah[:, None] + acy[:, None]
    cx = dx * aw[:, None] + acx[:, None]
    h = np.exp(dh) * ah[:, None]
    w = np.exp(dw) * aw[:, None]
    roi = np.zeros(pred.shape, dtype=pred.dtype)
    roi[:, :, 0::4] = cx - 0.5 * w
    roi[:, :, 1::4] = cy - 0.5 * h
    roi[:, :, 2::4] = cx + 0.5 * w
    roi[:, :, 3::4] = cy + 0.5 * h
    roi[:, :, slice(0, 4, 2)] = np.clip(roi[:, :, slice(0, 4, 2)], 0, img_x)
    roi[:, :, slice(1, 4, 2)] = np.clip(roi[:, :, slice(1, 4, 2)], 0, img_y)
    return roi


def _nms_offsets_reference_np(boxes, thresh):
    x1, y1, x2, y2 = boxes[:, 0], boxes[:, 1], boxes[:, 2], boxes[:, 3]
    areas = (x2 - x1 + 1.0) * (y2 - y1 + 1.0)
    xx1 = np.maximum(x1[:, None], x1[None, :])
    yy1 = np.maximum(y1[:, None], y1[None, :])
    xx2 = np.minimum(x2[:, None], x2[None, :])
    yy2 = np.minimum(y2[:, None], y2[None, :])
    w = np.maximum(0.0, xx2 - xx1 + 1.0)
    h = np.maximum(0.0, yy2 - yy1 + 1.0)
    inter = w * h
    ovr = inter / (areas[:, None] + areas[None, :] - inter)
    zs, js = np.nonzero(np.triu(ovr >= thresh, 1))
    return np.unique(js - zs - 1)


def _make_anchors(H, W, stride, scales=(32.0, 64.0, 128.0), ratios=(0.5, 1.0, 2.0)):
    boxes = []
    for ix in range(H):
        for iy in range(W):
            cx = ix * stride + stride / 2.0
            cy = iy * stride + stride / 2.0
            for s in scales:
                for r in ratios:
                    w = s * np.sqrt(r)
                    h = s / np.sqrt(r)
                    boxes.append([cx - w / 2, cy - h / 2, cx + w / 2, cy + h / 2])
    return np.asarray(boxes, np.float32)


if __name__ == "__main__":
    # Small config consistent with the module's forward (module default is
    # image_size=(1333, 402); reduced image for a quick demo run).
    image_size = (256, 128)
    min_size = 16
    H = image_size[0] // min_size   # 16
    W = image_size[1] // min_size   # 8
    A = H * W * 9                   # 1152 anchors
    B = 2

    key = jax.random.PRNGKey(0)
    k1, k2, k3, k4 = jax.random.split(key, 4)
    rpn_cls_score = np.asarray(jax.random.normal(k1, (B, H * W * 9 * 2), jnp.float32))
    rpn_bbox_pred = np.asarray(0.1 * jax.random.normal(k2, (B, A, 4), jnp.float32))
    anchor = Anchor(_make_anchors(H, W, stride=min_size))
    image = np.zeros((B, 3, image_size[0], image_size[1]), np.float32)

    layer = ProposalLayerPallas(image_size=image_size, min_size=min_size)
    batch_roi = layer(anchor, rpn_cls_score, rpn_bbox_pred, None, None, image)
    for r in batch_roi:
        assert r.ndim == 2 and r.shape[1] == 4

    # spot-check the Pallas decode kernel against the numpy reference math
    anchor_np = np.asarray(anchor.anchor_boxes, np.float32)
    roi_pallas, _ = decode_proposals(anchor_np, rpn_bbox_pred,
                                     image_size[0], image_size[1], min_size)
    roi_ref = _decode_reference_np(anchor_np, rpn_bbox_pred, image_size[0], image_size[1])
    np.testing.assert_allclose(roi_pallas, roi_ref, rtol=1e-4, atol=1e-2)

    # spot-check the Pallas NMS path: per-diagonal-offset hits vs. the numpy reference
    xy = np.asarray(jax.random.uniform(k3, (200, 2), jnp.float32, 0.0, 200.0))
    wh = np.asarray(jax.random.uniform(k4, (200, 2), jnp.float32, 1.0, 100.0))
    boxes_chk = np.concatenate([xy, xy + wh], axis=1).astype(np.float32)
    hits_dev = launch_nms_offset_hits(boxes_chk, 0.7)
    jax.block_until_ready(hits_dev)
    d_pallas = np.nonzero(np.asarray(hits_dev)[1:])[0]
    d_ref = _nms_offsets_reference_np(boxes_chk, 0.7)
    np.testing.assert_array_equal(d_pallas, d_ref)

    print("KERNEL_OK")
</pallas_src>

<mosaic_0001>
module attributes {stable_mosaic.version = 11 : i64} {
  func.func @_decode_kernel(%arg0: i32, %arg1: i32, %arg2: memref<4x32x128xf32, #tpu.memory_space<vmem>>, %arg3: memref<1x4x32x128xf32, #tpu.memory_space<vmem>>, %arg4: memref<1x4x32x128xf32, #tpu.memory_space<vmem>>, %arg5: memref<1x1x32x128xi8, #tpu.memory_space<vmem>>) attributes {dimension_semantics = [#tpu.dimension_semantics<parallel>, #tpu.dimension_semantics<parallel>], iteration_bounds = array<i64: 1, 2>, scalar_prefetch = 0 : i64, scratch_operands = 0 : i64, tpu.core_type = #tpu.core_type<tc>, window_params = [{transform_indices = @transform_0, window_bounds = array<i64: 4, 32, 128>}, {transform_indices = @transform_1, window_bounds = array<i64: 1, 4, 32, 128>}, {transform_indices = @transform_2, window_bounds = array<i64: 1, 4, 32, 128>}, {transform_indices = @transform_3, window_bounds = array<i64: 1, 1, 32, 128>}]} {
    %c0 = arith.constant 0 : index
    %c0_0 = arith.constant 0 : index
    %c0_1 = arith.constant 0 : index
    %0 = vector.load %arg2[%c0, %c0_0, %c0_1] : memref<4x32x128xf32, #tpu.memory_space<vmem>>, vector<4x32x128xf32>
    %c0_2 = arith.constant 0 : index
    %c0_3 = arith.constant 0 : index
    %c0_4 = arith.constant 0 : index
    %c0_5 = arith.constant 0 : index
    %1 = vector.load %arg3[%c0_2, %c0_3, %c0_4, %c0_5] : memref<1x4x32x128xf32, #tpu.memory_space<vmem>>, vector<1x4x32x128xf32>
    %2 = vector.shape_cast %1 : vector<1x4x32x128xf32> to vector<4x32x128xf32>
    %3 = vector.extract_strided_slice %0 {offsets = [0, 0, 0], sizes = [1, 32, 128], strides = [1, 1, 1]} : vector<4x32x128xf32> to vector<1x32x128xf32>
    %4 = vector.shape_cast %3 : vector<1x32x128xf32> to vector<32x128xf32>
    %5 = vector.extract_strided_slice %0 {offsets = [1, 0, 0], sizes = [1, 32, 128], strides = [1, 1, 1]} : vector<4x32x128xf32> to vector<1x32x128xf32>
    %6 = vector.shape_cast %5 : vector<1x32x128xf32> to vector<32x128xf32>
    %7 = vector.extract_strided_slice %0 {offsets = [2, 0, 0], sizes = [1, 32, 128], strides = [1, 1, 1]} : vector<4x32x128xf32> to vector<1x32x128xf32>
    %8 = vector.shape_cast %7 : vector<1x32x128xf32> to vector<32x128xf32>
    %9 = vector.extract_strided_slice %0 {offsets = [3, 0, 0], sizes = [1, 32, 128], strides = [1, 1, 1]} : vector<4x32x128xf32> to vector<1x32x128xf32>
    %10 = vector.shape_cast %9 : vector<1x32x128xf32> to vector<32x128xf32>
    %11 = vector.extract_strided_slice %2 {offsets = [0, 0, 0], sizes = [1, 32, 128], strides = [1, 1, 1]} : vector<4x32x128xf32> to vector<1x32x128xf32>
    %12 = vector.shape_cast %11 : vector<1x32x128xf32> to vector<32x128xf32>
    %13 = vector.extract_strided_slice %2 {offsets = [1, 0, 0], sizes = [1, 32, 128], strides = [1, 1, 1]} : vector<4x32x128xf32> to vector<1x32x128xf32>
    %14 = vector.shape_cast %13 : vector<1x32x128xf32> to vector<32x128xf32>
    %15 = vector.extract_strided_slice %2 {offsets = [2, 0, 0], sizes = [1, 32, 128], strides = [1, 1, 1]} : vector<4x32x128xf32> to vector<1x32x128xf32>
    %16 = vector.shape_cast %15 : vector<1x32x128xf32> to vector<32x128xf32>
    %17 = vector.extract_strided_slice %2 {offsets = [3, 0, 0], sizes = [1, 32, 128], strides = [1, 1, 1]} : vector<4x32x128xf32> to vector<1x32x128xf32>
    %18 = vector.shape_cast %17 : vector<1x32x128xf32> to vector<32x128xf32>
    %19 = arith.subf %10, %6 : vector<32x128xf32>
    %20 = arith.subf %8, %4 : vector<32x128xf32>
    %cst = arith.constant 5.000000e-01 : f32
    %21 = vector.broadcast %cst : f32 to vector<32x128xf32>
    %22 = arith.mulf %21, %19 : vector<32x128xf32>
    %23 = arith.addf %6, %22 : vector<32x128xf32>
    %cst_6 = arith.constant 5.000000e-01 : f32
    %24 = vector.broadcast %cst_6 : f32 to vector<32x128xf32>
    %25 = arith.mulf %24, %20 : vector<32x128xf32>
    %26 = arith.addf %4, %25 : vector<32x128xf32>
    %27 = arith.mulf %14, %19 : vector<32x128xf32>
    %28 = arith.addf %27, %23 : vector<32x128xf32>
    %29 = arith.mulf %12, %20 : vector<32x128xf32>
    %30 = arith.addf %29, %26 : vector<32x128xf32>
    %31 = math.exp %18 : vector<32x128xf32>
    %32 = arith.mulf %31, %19 : vector<32x128xf32>
    %33 = math.exp %16 : vector<32x128xf32>
    %34 = arith.mulf %33, %20 : vector<32x128xf32>
    %cst_7 = arith.constant 5.000000e-01 : f32
    %35 = vector.broadcast %cst_7 : f32 to vector<32x128xf32>
    %36 = arith.mulf %35, %34 : vector<32x128xf32>
    %37 = arith.subf %30, %36 : vector<32x128xf32>
    %cst_8 = arith.constant 0.000000e+00 : f32
    %cst_9 = arith.constant 2.560000e+02 : f32
    %38 = vector.broadcast %cst_8 : f32 to vector<32x128xf32>
    %39 = arith.maximumf %38, %37 : vector<32x128xf32>
    %40 = vector.broadcast %cst_9 : f32 to vector<32x128xf32>
    %41 = arith.minimumf %40, %39 : vector<32x128xf32>
    %cst_10 = arith.constant 5.000000e-01 : f32
    %42 = vector.broadcast %cst_10 : f32 to vector<32x128xf32>
    %43 = arith.mulf %42, %32 : vector<32x128xf32>
    %44 = arith.subf %28, %43 : vector<32x128xf32>
    %cst_11 = arith.constant 0.000000e+00 : f32
    %cst_12 = arith.constant 1.280000e+02 : f32
    %45 = vector.broadcast %cst_11 : f32 to vector<32x128xf32>
    %46 = arith.maximumf %45, %44 : vector<32x128xf32>
    %47 = vector.broadcast %cst_12 : f32 to vector<32x128xf32>
    %48 = arith.minimumf %47, %46 : vector<32x128xf32>
    %cst_13 = arith.constant 5.000000e-01 : f32
    %49 = vector.broadcast %cst_13 : f32 to vector<32x128xf32>
    %50 = arith.mulf %49, %34 : vector<32x128xf32>
    %51 = arith.addf %30, %50 : vector<32x128xf32>
    %cst_14 = arith.constant 0.000000e+00 : f32
    %cst_15 = arith.constant 2.560000e+02 : f32
    %52 = vector.broadcast %cst_14 : f32 to vector<32x128xf32>
    %53 = arith.maximumf %52, %51 : vector<32x128xf32>
    %54 = vector.broadcast %cst_15 : f32 to vector<32x128xf32>
    %55 = arith.minimumf %54, %53 : vector<32x128xf32>
    %cst_16 = arith.constant 5.000000e-01 : f32
    %56 = vector.broadcast %cst_16 : f32 to vector<32x128xf32>
    %57 = arith.mulf %56, %32 : vector<32x128xf32>
    %58 = arith.addf %28, %57 : vector<32x128xf32>
    %cst_17 = arith.constant 0.000000e+00 : f32
    %cst_18 = arith.constant 1.280000e+02 : f32
    %59 = vector.broadcast %cst_17 : f32 to vector<32x128xf32>
    %60 = arith.maximumf %59, %58 : vector<32x128xf32>
    %61 = vector.broadcast %cst_18 : f32 to vector<32x128xf32>
    %62 = arith.minimumf %61, %60 : vector<32x128xf32>
    %c0_19 = arith.constant 0 : index
    %c0_20 = arith.constant 0 : index
    %c0_21 = arith.constant 0 : index
    %c0_22 = arith.constant 0 : index
    %63 = vector.load %arg4[%c0_19, %c0_20, %c0_21, %c0_22] : memref<1x4x32x128xf32, #tpu.memory_space<vmem>>, vector<1x1x32x128xf32>
    %64 = vector.shape_cast %63 : vector<1x1x32x128xf32> to vector<32x128xf32>
    %65 = vector.shape_cast %41 : vector<32x128xf32> to vector<1x1x32x128xf32>
    tpu.vector_store %arg4[%c0_19, %c0_20, %c0_21, %c0_22], %65 {strides = array<i32>} : memref<1x4x32x128xf32, #tpu.memory_space<vmem>>, vector<1x1x32x128xf32>,
    %c0_23 = arith.constant 0 : index
    %c1 = arith.constant 1 : index
    %c0_24 = arith.constant 0 : index
    %c0_25 = arith.constant 0 : index
    %66 = vector.load %arg4[%c0_23, %c1, %c0_24, %c0_25] : memref<1x4x32x128xf32, #tpu.memory_space<vmem>>, vector<1x1x32x128xf32>
    %67 = vector.shape_cast %66 : vector<1x1x32x128xf32> to vector<32x128xf32>
    %68 = vector.shape_cast %48 : vector<32x128xf32> to vector<1x1x32x128xf32>
    tpu.vector_store %arg4[%c0_23, %c1, %c0_24, %c0_25], %68 {strides = array<i32>} : memref<1x4x32x128xf32, #tpu.memory_space<vmem>>, vector<1x1x32x128xf32>,
    %c0_26 = arith.constant 0 : index
    %c2 = arith.constant 2 : index
    %c0_27 = arith.constant 0 : index
    %c0_28 = arith.constant 0 : index
    %69 = vector.load %arg4[%c0_26, %c2, %c0_27, %c0_28] : memref<1x4x32x128xf32, #tpu.memory_space<vmem>>, vector<1x1x32x128xf32>
    %70 = vector.shape_cast %69 : vector<1x1x32x128xf32> to vector<32x128xf32>
    %71 = vector.shape_cast %55 : vector<32x128xf32> to vector<1x1x32x128xf32>
    tpu.vector_store %arg4[%c0_26, %c2, %c0_27, %c0_28], %71 {strides = array<i32>} : memref<1x4x32x128xf32, #tpu.memory_space<vmem>>, vector<1x1x32x128xf32>,
    %c0_29 = arith.constant 0 : index
    %c3 = arith.constant 3 : index
    %c0_30 = arith.constant 0 : index
    %c0_31 = arith.constant 0 : index
    %72 = vector.load %arg4[%c0_29, %c3, %c0_30, %c0_31] : memref<1x4x32x128xf32, #tpu.memory_space<vmem>>, vector<1x1x32x128xf32>
    %73 = vector.shape_cast %72 : vector<1x1x32x128xf32> to vector<32x128xf32>
    %74 = vector.shape_cast %62 : vector<32x128xf32> to vector<1x1x32x128xf32>
    tpu.vector_store %arg4[%c0_29, %c3, %c0_30, %c0_31], %74 {strides = array<i32>} : memref<1x4x32x128xf32, #tpu.memory_space<vmem>>, vector<1x1x32x128xf32>,
    %75 = arith.subf %62, %48 : vector<32x128xf32>
    %cst_32 = arith.constant 1.600000e+01 : f32
    %76 = vector.broadcast %cst_32 : f32 to vector<32x128xf32>
    %77 = arith.cmpf oge, %75, %76 : vector<32x128xf32>
    %78 = arith.subf %55, %41 : vector<32x128xf32>
    %cst_33 = arith.constant 1.600000e+01 : f32
    %79 = vector.broadcast %cst_33 : f32 to vector<32x128xf32>
    %80 = arith.cmpf oge, %78, %79 : vector<32x128xf32>
    %81 = arith.andi %77, %80 : vector<32x128xi1>
    %82 = arith.extui %81 : vector<32x128xi1> to vector<32x128xi8>
    %c0_34 = arith.constant 0 : index
    %c0_35 = arith.constant 0 : index
    %c0_36 = arith.constant 0 : index
    %c0_37 = arith.constant 0 : index
    %83 = vector.load %arg5[%c0_34, %c0_35, %c0_36, %c0_37] : memref<1x1x32x128xi8, #tpu.memory_space<vmem>>, vector<1x1x32x128xi8>
    %84 = vector.shape_cast %83 : vector<1x1x32x128xi8> to vector<32x128xi8>
    %85 = vector.shape_cast %82 : vector<32x128xi8> to vector<1x1x32x128xi8>
    tpu.vector_store %arg5[%c0_34, %c0_35, %c0_36, %c0_37], %85 {strides = array<i32>} : memref<1x1x32x128xi8, #tpu.memory_space<vmem>>, vector<1x1x32x128xi8>,
    return
  }
  func.func @transform_0(%arg0: i32, %arg1: i32) -> (i32, i32, i32) {
    %c0_i32 = arith.constant 0 : i32
    %c0_i32_0 = arith.constant 0 : i32
    %c0_i32_1 = arith.constant 0 : i32
    return %c0_i32, %arg0, %c0_i32_0 : i32, i32, i32
  }
  func.func @transform_1(%arg0: i32, %arg1: i32) -> (i32, i32, i32, i32) {
    %c0_i32 = arith.constant 0 : i32
    %c0_i32_0 = arith.constant 0 : i32
    %c0_i32_1 = arith.constant 0 : i32
    return %arg1, %c0_i32, %arg0, %c0_i32_0 : i32, i32, i32, i32
  }
  func.func @transform_2(%arg0: i32, %arg1: i32) -> (i32, i32, i32, i32) {
    %c0_i32 = arith.constant 0 : i32
    %c0_i32_0 = arith.constant 0 : i32
    %c0_i32_1 = arith.constant 0 : i32
    return %arg1, %c0_i32, %arg0, %c0_i32_0 : i32, i32, i32, i32
  }
  func.func @transform_3(%arg0: i32, %arg1: i32) -> (i32, i32, i32, i32) {
    %c0_i32 = arith.constant 0 : i32
    %c0_i32_0 = arith.constant 0 : i32
    %c0_i32_1 = arith.constant 0 : i32
    return %arg1, %c0_i32, %arg0, %c0_i32_0 : i32, i32, i32, i32
  }
}

</mosaic_0001>

<bundles_post_ra>
// kernel: tpu_custom_call.1
= control target key start
LH: loop header
LB: loop body
LE: loop exit
PB: predicated region body
PF: predicated region fallthrough
CT: control target
= control target key end

     0   :  { %9 = vsyncpa [#allocation3], 0  ;;  %s1327_s0 = inlined_call_operand.hbm [shape: f32[4,32,128], index: 0, kind: input, shape index: {}]   ;;  %s1328_s1 = inlined_call_operand.hbm [shape: f32[2,4,32,128], index: 1, kind: input, shape index: {}]   ;;  %s1329_s2 = inlined_call_operand.hbm [shape: f32[2,4,32,128], index: 2, kind: output, shape index: {0}]   ;;  %s1330_s3 = inlined_call_operand.hbm [shape: s8[2,1,32,128], index: 3, kind: output, shape index: {1}]  }
   0x1   :  { %10 = vsyncpa [#allocation6], 0 }
   0x2   :  { %12 = vsyncpa [#allocation6 + $0x1], 0 }
   0x3   :  { %13 = vsyncpa [#allocation4], 0 }
   0x4   :  { %15 = vsyncpa [#allocation4 + $0x1], 0 }
   0x5   :  { %16 = vsyncpa [#allocation9], 0 }
   0x6   :  { %18 = vsyncpa [#allocation9 + $0x1], 0  ;;  %s953_s12 = smov 0   ;;  %s955_s13 = smov 0  }
   0x7   :  { %s957_s14 = smov 0   ;;  %s959_s15 = smov 0  }
   0x8   :  { %s961_s16 = smov 0   ;;  %s963_s17 = smov 0  }
   0x9 LB: > { %s613_s18 = sadd.s32 4294967295, %s922_s17   ;;  %s614_s19 = sadd.s32 4294967294, %s922_s17   ;;  %s922_s17 = sphi %s963_s17, %s24_s17   ;;  %s918_s16 = sphi %s961_s16, %s1358_s16   ;;  %s914_s15 = sphi %s959_s15, %s1357_s15   ;;  %s910_s14 = sphi %s957_s14, %s1356_s14   ;;  %s906_s13 = sphi %s955_s13, %s1355_s13   ;;  %s902_s12 = sphi %s953_s12, %s1354_s12  }
   0xa   : > { %p84_p0 = scmp.ne.s32.totalorder %s906_s13, %s902_s12  ;;  %p987_p1 = scmp.eq.s32.totalorder %s613_s18, 0 }
   0xb   : > { %p991_p2 = scmp.eq.s32.totalorder %s613_s18, 1  ;;  %p116_p3 = scmp.eq.s32.totalorder %s614_s19, 1 }
   0xc   : > { %s1335_s20 = scalar_select %p987_p1, 1, 0 }
   0xd   : > { %s1336_s21 = scalar_select %p991_p2, 1, 0 }
   0xe   : > { %p997_p4 = por %p987_p1, %p84_p0  ;;  %p615_p5 = scmp.ge.s32.totalorder %s922_s17, 1 }
   0xf   : > { %p1002_p6 = por %p116_p3, %p84_p0  ;;  %p151_p7 = scmp.lt.s32.totalorder %s922_s17, 3 }
  0x10   : > { %s1337_s22 = scalar_select %p997_p4, 1, 0 }
  0x11   : > { %s1338_s23 = scalar_select %p1002_p6, 1, 0 }
  0x12   : > { %p1007_p8 = pnand %p615_p5, %p151_p7  ;;  %s924_s25 = smov [#allocation2]  }
  0x13   : > { %s166_s26 = sshll.u32 %s924_s25, 4  ;;  %s33_s28 = sadd.s32 1, %s918_s16  ;;  %s167_s26 = int_to_ptr.vmem [resolvable:$true] %s166_s26 }
  0x14   : > { %s1339_s24 = scalar_select %p1007_p8, 1, 0 }
  0x15   : > { %p657_p9 = pneg %p1007_p8  ;;  %s746_s4 = scalar_lea.hbm %s1327_s0, 2048 }
  0x16   : > { %p747_p12 = scmp.ne.s32.totalorder %s1327_s0, %s746_s4  ;;  %p753_p5 = scmp.lt.u32.totalorder %s746_s4, %s1327_s0 }
  0x17   : > { %p1016_p11 = pnand %p657_p9, %p987_p1 }
  0x19   : > { %p748_p13 = pneg %p1016_p11 }
  0x1b   : > { %p749_p0 = pnand %p748_p13, %p747_p12 }
  0x1d   : > { %p750_p3 = pneg %p749_p0 }
  0x1f   : > { %p755_p7 = pnand %p753_p5, %p750_p3 }
  0x21   : > { %758 = shalt.err (!%p755_p7)
}
  0x22   : > { %s759_s9 = scalar_lea.vmem %s167_s26, 2048  ;;  %p767_p4 = scmp.lt.s32.totalorder %s167_s26, %s167_s26 }
  0x23   : > { %p760_p9 = scmp.ne.s32.totalorder %s167_s26, %s759_s9  ;;  %p768_p1 = scmp.lt.s32.totalorder %s759_s9, %s759_s9 }
  0x25   : > { %p762_p10 = pnand %p760_p9, %p748_p13  ;;  %p769_p8 = por %p768_p1, %p767_p4 }
  0x27   : > { %p763_p6 = pneg %p762_p10 }
  0x29   : > { %p770_p2 = pnand %p769_p8, %p763_p6 }
  0x2b   : > { %773 = shalt.err (!%p770_p2)
}
  0x2c   : > { %s925_s10 = smov 128   ;;  %s926_s11 = smov 8  }
  0x2d   : > { %660 = dma.hbm_to_vmem [thread:$0]  (!%p1016_p11), %s1327_s0, 2048, %s167_s26, [#allocation3], %s925_s10, %s925_s10, %s926_s11  }
  0x2e   : > { %p34_p1 = scmp.ge.s32.totalorder %s33_s28, 2  ;;  %s71_s25 = sadd.s32 1, %s910_s14 }
  0x2f   : > { %p78_p2 = scmp.ne.s32.totalorder %s910_s14, %s906_s13  ;;  %p79_p4 = scmp.eq.s32.totalorder %s922_s17, 0 }
  0x30   : > { %s1360_s28 = smov (%p34_p1, %s33_s28), 0  ;;  %p1342_p8 = scmp.ne.s32.totalorder %s1336_s21, 0 }
  0x31   : > { %p1046_p6 = por %p79_p4, %p78_p2  ;;  %s66_s30 = ssub.s32 %s918_s16, %s1360_s28 }
  0x32   : > { %p1052_p10 = por %p1342_p8, %p78_p2  ;;  %p673_p12 = scmp.lt.s32.totalorder %s922_s17, 2 }
  0x33   : > { %p69_p11 = scmp.eq.s32.totalorder %s66_s30, 0  ;;  %s180_s26 = sand.u32 1, %s910_s14  }
  0x34   : > { %s618_s4 = sshll.u32 %s180_s26, 7  ;;  %s645_s6 = sshll.u32 %s918_s16, 11 }
  0x35   : > { %s1061_s5 = scalar_select %p69_p11, %s910_s14, %s71_s25  }
  0x36   : > { %s1067_s9 = scalar_lea.hbm %s1328_s1, %s645_s6  ;;  %s184_s21 = scalar_lea.vmem [#allocation5], %s618_s4 }
  0x37   : > { %s193_s18 = sshll.u32 %s184_s21, 4  ;;  %p1073_p13 = pnand %p673_p12, %p1046_p6  ;;  %s1069_s18 = int_to_ptr.vmem [resolvable:$true] %s193_s18 }
  0x38   : > { %s1077_s25 = scalar_lea.sflag [#allocation6], %s180_s26  ;;  %s774_s30 = scalar_lea.hbm %s1067_s9, 2048 }
  0x39   : > { %p775_p0 = scmp.ne.s32.totalorder %s1067_s9, %s774_s30  ;;  %p776_p3 = pneg %p1073_p13 }
  0x3a   : > { %s779_s29 = scalar_lea.hbm %s1328_s1, 4096  ;;  %p780_p9 = scmp.lt.u32.totalorder %s1067_s9, %s1328_s1 }
  0x3b   : > { %p777_p5 = pnand %p776_p3, %p775_p0  ;;  %p781_p1 = scmp.lt.u32.totalorder %s779_s29, %s774_s30 }
  0x3c   : > { %p783_p4 = scmp.lt.u32.totalorder %s774_s30, %s1067_s9 }
  0x3d   : > { %p778_p7 = pneg %p777_p5  ;;  %p782_p2 = por %p781_p1, %p780_p9 }
  0x3f   : > { %p784_p6 = por %p783_p4, %p782_p2 }
  0x41   : > { %p785_p8 = pnand %p784_p6, %p778_p7 }
  0x43   : > { %788 = shalt.err (!%p785_p8)
}
  0x44   : > { %s789_s26 = scalar_lea.vmem %s1069_s18, 2048  ;;  %s927_s21 = smov [#allocation5]  }
  0x45   : > { %p790_p12 = scmp.ne.s32.totalorder %s1069_s18, %s789_s26  ;;  %s794_s4 = sshll.u32 %s927_s21, 4  ;;  %s795_s4 = int_to_ptr.vmem [resolvable:$false] %s794_s4 }
  0x46   : > { %s796_s6 = scalar_lea.vmem %s795_s4, 4096  ;;  %p797_p5 = scmp.lt.s32.totalorder %s1069_s18, %s795_s4 }
  0x47   : > { %p792_p11 = pnand %p790_p12, %p776_p3  ;;  %p798_p9 = scmp.lt.s32.totalorder %s796_s6, %s789_s26 }
  0x49   : > { %p793_p0 = pneg %p792_p11  ;;  %p799_p1 = por %p798_p9, %p797_p5 }
  0x4b   : > { %p800_p2 = pnand %p799_p1, %p793_p0 }
  0x4d   : > { %803 = shalt.err (!%p800_p2)
}
  0x4e   : > { %664 = dma.hbm_to_vmem [thread:$0]  (!%p1073_p13), %s1067_s9, 2048, %s1069_s18, %s1077_s25, %s925_s10, %s925_s10, %s926_s11  }
  0x4f   : > { %p1345_p3 = scmp.ne.s32.totalorder %s1339_s24, 0 }
  0x50   : > { %p1346_p7 = scmp.ne.s32.totalorder (!%p1345_p3), %s1335_s20, 0 }
  0x51   : > { %205 = sbr.rel (%p1345_p3) target bundleno = 172 (0xac), region = 28 }
  0x58   : > { %885 = dma.done.wait (%p1346_p7), [#allocation3], 2048  }
  0x59   : > { %887 = vsyncadd (%p1346_p7), [#allocation3], 4294965248  ;;  %s1115_s30 = sand.u32 1, %s906_s13   ;;  %p1347_p13 = scmp.ne.s32.totalorder %s1337_s22, 0 }
  0x5a   : > { %s623_s19 = sshll.u32 %s1115_s30, 7  ;;  %s212_s29 = scalar_lea.sflag [#allocation6], %s1115_s30 }
  0x5b   : > { %s1121_s10 = scalar_lea.vmem [#allocation5], %s623_s19 }
  0x5c   : > { %889 = dma.done.wait (%p1347_p13), %s212_s29, 2048  }
  0x5d   : > { %891 = vsyncadd (%p1347_p13), %s212_s29, 4294965248  ;;  %v248_v0 = vld [vmem:[#allocation2] sm:$0xff]  ;;  %v249_v4 = vld [vmem:[#allocation2 + $0x8] sm:$0xff]  ;;  %s1183_s20 = scalar_lea.vmem [#allocation7], %s623_s19  ;;  %s625_s22 = sshll.u32 %s1115_s30, 3 }
  0x5e   : > { %v256_v1 = vld [vmem:[#allocation2 + $0x40] sm:$0xff]  ;;  %v257_v5 = vld [vmem:[#allocation2 + $0x48] sm:$0xff]  ;;  %v250_v9 = vld [vmem:[#allocation2 + $0x10] sm:$0xff]  ;;  %s646_s24 = sshll.u32 %s914_s15, 11  ;;  %s465_s11 = sshll.u32 %s1183_s20, 4  ;;  %s1220_s11 = int_to_ptr.vmem [resolvable:$true] %s465_s11 }
  0x5f   : > { %v272_v2 = vld [vmem:[%s1121_s10 + $0x40] sm:$0xff]  ;;  %v1128_v3 = vsub.f32 %v256_v1, %v248_v0  ;;  %v273_v7 = vld [vmem:[%s1121_s10 + $0x48] sm:$0xff]  ;;  %v1131_v8 = vsub.f32 %v257_v5, %v249_v4  ;;  %v258_v13 = vld [vmem:[#allocation2 + $0x50] sm:$0xff]  ;;  %s1211_s25 = scalar_lea.hbm %s1329_s2, %s646_s24  ;;  %s1231_s7 = scalar_lea.vmem [#allocation8], %s625_s22 }
  0x60   : > { %v332_v6 = vmul.f32 1.442695, %v272_v2  ;;  %v264_v10 = vld [vmem:[%s1121_s10] sm:$0xff]  ;;  %v334_v12 = vmul.f32 1.442695, %v273_v7  ;;  %v274_v14 = vld [vmem:[%s1121_s10 + $0x50] sm:$0xff]  ;;  %v1138_v19 = vsub.f32 %v258_v13, %v250_v9 }
  0x61   : > { %v296_v11 = vmul.f32 0.5, %v1128_v3  ;;  %v265_v15 = vld [vmem:[%s1121_s10 + $0x8] sm:$0xff]  ;;  %v297_v16 = vmul.f32 0.5, %v1131_v8  ;;  %v251_v17 = vld [vmem:[#allocation2 + $0x18] sm:$0xff]  ;;  %v336_v20 = vmul.f32 1.442695, %v274_v14  ;;  %v312_v29 = vmul.f32 %v1128_v3, %v264_v10 }
  0x62   : > { %730 = vpow2.f32 %v332_v6  ;;  %v259_v18 = vld [vmem:[#allocation2 + $0x58] sm:$0xff]  ;;  %v252_v22 = vld [vmem:[#allocation2 + $0x20] sm:$0xff]  ;;  %v253_v27 = vld [vmem:[#allocation2 + $0x28] sm:$0xff]  ;;  %v313_v34 = vmul.f32 %v1131_v8, %v265_v15  ;;  %v298_v39 = vmul.f32 0.5, %v1138_v19  ;;  %s482_s8 = sshll.u32 %s1231_s7, 4  ;;  %s445_s26 = scalar_lea.sflag [#allocation4], %s1115_s30  ;;  %s1269_s8 = int_to_ptr.vmem [resolvable:$true] %s482_s8 }
  0x63   : > { %732 = vpow2.f32 %v334_v12  ;;  %v275_v21 = vld [vmem:[%s1121_s10 + $0x58] sm:$0xff]  ;;  %v260_v23 = vld [vmem:[#allocation2 + $0x60] sm:$0xff]  ;;  %v1141_v24 = vsub.f32 %v259_v18, %v251_v17  ;;  %v300_v28 = vadd.f32 %v296_v11, %v248_v0  ;;  %v266_v30 = vld [vmem:[%s1121_s10 + $0x10] sm:$0xff]  ;;  %v301_v33 = vadd.f32 %v297_v16, %v249_v4  ;;  %s804_s21 = scalar_lea.vmem %s1220_s11, 2048  ;;  %s928_s4 = smov [#allocation7]  }
  0x64   : > { %v338_v25 = vmul.f32 1.442695, %v275_v21  ;;  %v276_v26 = vld [vmem:[%s1121_s10 + $0x60] sm:$0xff]  ;;  %734 = vpow2.f32 %v336_v20  ;;  %v261_v31 = vld [vmem:[#allocation2 + $0x68] sm:$0xff]  ;;  %v267_v35 = vld [vmem:[%s1121_s10 + $0x18] sm:$0xff]  ;;  %v1149_v36 = vsub.f32 %v260_v23, %v252_v22  ;;  %v314_v51 = vmul.f32 %v1138_v19, %v266_v30  ;;  %p805_p4 = scmp.ne.s32.totalorder %s1220_s11, %s804_s21  ;;  %s808_s6 = sshll.u32 %s928_s4, 4  ;;  %s809_s6 = int_to_ptr.vmem [resolvable:$false] %s808_s6 }
  0x65   : > { %v277_v32 = vld [vmem:[%s1121_s10 + $0x68] sm:$0xff]  ;;  %v254_v37 = vld [vmem:[#allocation2 + $0x30] sm:$0xff]  ;;  %v320_v40 = vmul.f32 1.442695, %v276_v26  ;;  %v1152_v41 = vsub.f32 %v261_v31, %v253_v27  ;;  %v299_v44 = vmul.f32 0.5, %v1141_v24  ;;  %v255_v47 = vld [vmem:[#allocation2 + $0x38] sm:$0xff]  ;;  %v316_v50 = vadd.f32 %v312_v29, %v300_v28  ;;  %p811_p12 = scmp.lt.s32.totalorder %s1220_s11, %s809_s6 }
  0x66   : > { %736 = vpow2.f32 %v338_v25  ;;  %v262_v38 = vld [vmem:[#allocation2 + $0x70] sm:$0xff]  ;;  %v322_v42 = vmul.f32 1.442695, %v277_v32  ;;  %v288_v45 = vmul.f32 0.5, %v1149_v36  ;;  %v263_v48 = vld [vmem:[#allocation2 + $0x78] sm:$0xff]  ;;  %v268_v52 = vld [vmem:[%s1121_s10 + $0x20] sm:$0xff]  ;;  %v317_v55 = vadd.f32 %v313_v34, %v301_v33  ;;  %p806_p6 = pnand %p805_p4, %p1052_p10 }
  0x67   : > { %v278_v43 = vld [vmem:[%s1121_s10 + $0x70] sm:$0xff]  ;;  %v1157_v46 = vsub.f32 %v262_v38, %v254_v37  ;;  %v279_v49 = vld [vmem:[%s1121_s10 + $0x78] sm:$0xff]  ;;  %738 = vpow2.f32 %v320_v40  ;;  %v269_v53 = vld [vmem:[%s1121_s10 + $0x28] sm:$0xff]  ;;  %v289_v54 = vmul.f32 0.5, %v1152_v41  ;;  %v315_v56 = vmul.f32 %v1141_v24, %v267_v35  ;;  %s810_s19 = scalar_lea.vmem %s809_s6, 4096 }
  0x68   : > { %740 = vpow2.f32 %v322_v42  ;;  %v302_v58 = vadd.f32 %v298_v39, %v250_v9  ;;  %v270_v59 = vld [vmem:[%s1121_s10 + $0x30] sm:$0xff]  ;;  %v324_v60 = vmul.f32 1.442695, %v278_v43  ;;  %v1167_v61 = vsub.f32 %v263_v48, %v255_v47  ;;  %v271_v5 = vld [vmem:[%s1121_s10 + $0x38] sm:$0xff]  ;;  %p807_p8 = pneg %p806_p6  ;;  %p812_p11 = scmp.lt.s32.totalorder %s810_s19, %s804_s21 }
  0x69   : > { %v290_v57 = vmul.f32 0.5, %v1157_v46  ;;  %v326_v62 = vmul.f32 1.442695, %v279_v49  ;;  %v303_v0 = vadd.f32 %v299_v44, %v251_v17  ;;  %v292_v1 = vadd.f32 %v288_v45, %v252_v22 }
  0x6a   : > { %v304_v2 = vmul.f32 %v1149_v36, %v268_v52  ;;  %v305_v4 = vmul.f32 %v1152_v41, %v269_v53  ;;  %v293_v10 = vadd.f32 %v289_v54, %v253_v27  ;;  %742 = vpow2.f32 %v324_v60  ;;  %p813_p0 = por %p812_p11, %p811_p12 }
  0x6b   : > { %v291_v9 = vmul.f32 0.5, %v1167_v61  ;;  %v294_v12 = vadd.f32 %v290_v57, %v254_v37  ;;  %v306_v13 = vmul.f32 %v1157_v46, %v270_v59  ;;  %744 = vpow2.f32 %v326_v62 }
  0x6c   : > { %v731_v63 = vpop.eup %730  ;;  %v318_v16 = vadd.f32 %v314_v51, %v302_v58  ;;  %v307_v18 = vmul.f32 %v1167_v61, %v271_v5  ;;  %v319_v22 = vadd.f32 %v315_v56, %v303_v0  ;;  %v308_v23 = vadd.f32 %v304_v2, %v292_v1  ;;  %p814_p5 = pnand %p813_p0, %p807_p8 }
  0x6d   : > { %v733_v6 = vpop.eup %732  ;;  %v340_v7 = vmul.f32 %v731_v63, %v1128_v3  ;;  %v295_v17 = vadd.f32 %v291_v9, %v255_v47  ;;  %v310_v30 = vadd.f32 %v306_v13, %v294_v12 }
  0x6e   : > { %v341_v11 = vmul.f32 %v733_v6, %v1131_v8  ;;  %v735_v14 = vpop.eup %734  ;;  %v309_v8 = vadd.f32 %v305_v4, %v293_v10 }
  0x6f   : > { %v344_v15 = vmul.f32 0.5, %v340_v7  ;;  %v342_v3 = vmul.f32 %v735_v14, %v1138_v19  ;;  %v311_v35 = vadd.f32 %v307_v18, %v295_v17 }
  0x70   : > { %v737_v20 = vpop.eup %736  ;;  %v345_v21 = vmul.f32 0.5, %v341_v11 }
  0x71   : > { %v348_v25 = vsub.f32 %v316_v50, %v344_v15  ;;  %v343_v26 = vmul.f32 %v737_v20, %v1141_v24  ;;  %v376_v27 = vadd.f32 %v344_v15, %v316_v50  ;;  %v346_v29 = vmul.f32 0.5, %v342_v3  ;;  %v739_v32 = vpop.eup %738 }
  0x72   : > { %v349_v28 = vsub.f32 %v317_v55, %v345_v21  ;;  %v377_v31 = vadd.f32 %v345_v21, %v317_v55  ;;  %v741_v38 = vpop.eup %740  ;;  %v328_v40 = vmul.f32 %v739_v32, %v1149_v36 }
  0x73   : > { %v352_v33 = vmax.f32 %v348_v25, 0.0  ;;  %v347_v34 = vmul.f32 0.5, %v343_v26  ;;  %v380_v37 = vmax.f32 %v376_v27, 0.0  ;;  %v350_v19 = vsub.f32 %v318_v16, %v346_v29 }
  0x74   : > { %v353_v39 = vmax.f32 %v349_v28, 0.0  ;;  %v381_v42 = vmax.f32 %v377_v31, 0.0  ;;  %v329_v44 = vmul.f32 %v741_v38, %v1152_v41  ;;  %v360_v49 = vmul.f32 0.5, %v328_v40  ;;  %v743_v51 = vpop.eup %742 }
  0x75   : > { %v356_v43 = vmin.f32 %v352_v33, 256.0  ;;  %v351_v24 = vsub.f32 %v319_v22, %v347_v34  ;;  %v384_v45 = vmin.f32 %v380_v37, 256.0  ;;  %v354_v48 = vmax.f32 %v350_v19, 0.0  ;;  %v745_v54 = vpop.eup %744 }
  0x76   : > { %v357_v47 = vmin.f32 %v353_v39, 256.0  ;;  %v385_v50 = vmin.f32 %v381_v42, 256.0  ;;  %v361_v52 = vmul.f32 0.5, %v329_v44  ;;  %v378_v41 = vadd.f32 %v346_v29, %v318_v16 }
  0x77   : > { %400 = vst [vmem:[%s1183_s20] sm:$0xff] %v356_v43  ;;  %v355_v36 = vmax.f32 %v351_v24, 0.0  ;;  %630 = vst [vmem:[%s1183_s20 + $0x40] sm:$0xff] %v384_v45  ;;  %v1187_v53 = vsub.f32 %v384_v45, %v356_v43  ;;  %v358_v55 = vmin.f32 %v354_v48, 256.0  ;;  %v364_v56 = vsub.f32 %v308_v23, %v360_v49 }
  0x78   : > { %401 = vst [vmem:[%s1183_s20 + $0x8] sm:$0xff] %v357_v47  ;;  %v330_v57 = vmul.f32 %v743_v51, %v1157_v46  ;;  %631 = vst [vmem:[%s1183_s20 + $0x48] sm:$0xff] %v385_v50  ;;  %v428_v58 = vsub.f32 %v385_v50, %v357_v47  ;;  %v365_v60 = vsub.f32 %v309_v8, %v361_v52  ;;  %v382_v63 = vmax.f32 %v378_v41, 0.0 }
  0x79   : > { %v359_v59 = vmin.f32 %v355_v36, 256.0  ;;  %v331_v62 = vmul.f32 %v745_v54, %v1167_v61  ;;  %402 = vst [vmem:[%s1183_s20 + $0x10] sm:$0xff] %v358_v55  ;;  %v368_v0 = vmax.f32 %v364_v56, 0.0  ;;  %v379_v2 = vadd.f32 %v347_v34, %v319_v22 }
  0x7a   : > { %v362_v1 = vmul.f32 0.5, %v330_v57  ;;  %v388_v4 = vadd.f32 %v360_v49, %v308_v23  ;;  %v369_v5 = vmax.f32 %v365_v60, 0.0  ;;  %v386_v7 = vmin.f32 %v382_v63, 256.0 }
  0x7b   : > { %403 = vst [vmem:[%s1183_s20 + $0x18] sm:$0xff] %v359_v59  ;;  %v363_v6 = vmul.f32 0.5, %v331_v62  ;;  %v389_v46 = vadd.f32 %v361_v52, %v309_v8  ;;  %v372_v10 = vmin.f32 %v368_v0, 128.0  ;;  %v383_v11 = vmax.f32 %v379_v2, 0.0 }
  0x7c   : > { %v366_v9 = vsub.f32 %v310_v30, %v362_v1  ;;  %v392_v12 = vmax.f32 %v388_v4, 0.0  ;;  %v373_v61 = vmin.f32 %v369_v5, 128.0  ;;  %632 = vst [vmem:[%s1183_s20 + $0x50] sm:$0xff] %v386_v7  ;;  %v1196_v14 = vsub.f32 %v386_v7, %v358_v55 }
  0x7d   : > { %v367_v13 = vsub.f32 %v311_v35, %v363_v6  ;;  %v393_v15 = vmax.f32 %v389_v46, 0.0  ;;  %626 = vst [vmem:[%s1183_s20 + $0x20] sm:$0xff] %v372_v10  ;;  %v387_v17 = vmin.f32 %v383_v11, 256.0  ;;  %v390_v20 = vadd.f32 %v362_v1, %v310_v30 }
  0x7e   : > { %v370_v16 = vmax.f32 %v366_v9, 0.0  ;;  %v396_v18 = vmin.f32 %v392_v12, 128.0  ;;  %627 = vst [vmem:[%s1183_s20 + $0x28] sm:$0xff] %v373_v61  ;;  %v391_v22 = vadd.f32 %v363_v6, %v311_v35  ;;  %vm431_vm0 = vcmp.ge.f32.partialorder %v1187_v53, 16.0 }
  0x7f   : > { %v371_v21 = vmax.f32 %v367_v13, 0.0  ;;  %v397_v3 = vmin.f32 %v393_v15, 128.0  ;;  %633 = vst [vmem:[%s1183_s20 + $0x58] sm:$0xff] %v387_v17  ;;  %v430_v25 = vsub.f32 %v387_v17, %v359_v59  ;;  %v394_v8 = vmax.f32 %v390_v20, 0.0 }
  0x80   : > { %v374_v23 = vmin.f32 %v370_v16, 128.0  ;;  %634 = vst [vmem:[%s1183_s20 + $0x60] sm:$0xff] %v396_v18  ;;  %v419_v26 = vsub.f32 %v396_v18, %v372_v10  ;;  %v395_v29 = vmax.f32 %v391_v22, 0.0  ;;  %vm432_vm1 = vcmp.ge.f32.partialorder %v428_v58, 16.0 }
  0x81   : > { %v375_v27 = vmin.f32 %v371_v21, 128.0  ;;  %635 = vst [vmem:[%s1183_s20 + $0x68] sm:$0xff] %v397_v3  ;;  %v420_v28 = vsub.f32 %v397_v3, %v373_v61  ;;  %v398_v30 = vmin.f32 %v394_v8, 128.0  ;;  %vm433_vm5 = vcmp.ge.f32.partialorder %v1196_v14, 16.0 }
  0x82   : > { %628 = vst [vmem:[%s1183_s20 + $0x30] sm:$0xff] %v374_v23  ;;  %vm423_vm2 = vcmp.ge.f32.partialorder %v419_v26, 16.0  ;;  %v399_v31 = vmin.f32 %v395_v29, 128.0  ;;  %vm434_vm7 = vcmp.ge.f32.partialorder %v430_v25, 16.0 }
  0x83   : > { %629 = vst [vmem:[%s1183_s20 + $0x38] sm:$0xff] %v375_v27  ;;  %vm424_vm3 = vcmp.ge.f32.partialorder %v420_v28, 16.0  ;;  %vm1216_vm4 = vmand %vm423_vm2, %vm431_vm0  ;;  %v421_v33 = vsub.f32 %v398_v30, %v374_v23 }
  0x84   : > { %636 = vst [vmem:[%s1183_s20 + $0x70] sm:$0xff] %v398_v30  ;;  %vm1224_vm6 = vmand %vm424_vm3, %vm432_vm1  ;;  %v422_v35 = vsub.f32 %v399_v31, %v375_v27 }
  0x85   : > { %637 = vst [vmem:[%s1183_s20 + $0x78] sm:$0xff] %v399_v31  ;;  %vm425_vm8 = vcmp.ge.f32.partialorder %v421_v33, 16.0  ;;  %vm439_vm9 = vmpackc.low %vm1224_vm6, %vm1216_vm4 }
  0x86   : > { %817 = shalt.err (!%p814_p5)
}
  0x87   : > { %s818_s29 = scalar_lea.hbm %s1211_s25, 2048  ;;  %s822_s22 = scalar_lea.hbm %s1329_s2, 4096 }
  0x88   : > { %p819_p9 = scmp.ne.s32.totalorder %s1211_s25, %s818_s29  ;;  %p823_p3 = scmp.lt.u32.totalorder %s1211_s25, %s1329_s2 }
  0x89   : > { %p824_p7 = scmp.lt.u32.totalorder %s822_s22, %s818_s29  ;;  %p826_p4 = scmp.lt.u32.totalorder %s818_s29, %s1211_s25 }
  0x8a   : > { %p820_p1 = pnand %p819_p9, %p1052_p10 }
  0x8b   : > { %p825_p13 = por %p824_p7, %p823_p3 }
  0x8c   : > { %p821_p2 = pneg %p820_p1 }
  0x8d   : > { %p827_p6 = por %p826_p4, %p825_p13 }
  0x8f   : > { %p828_p8 = pnand %p827_p6, %p821_p2 }
  0x91   : > { %831 = shalt.err (!%p828_p8)
}
  0x92   : > { %s929_s18 = smov 128   ;;  %s930_s21 = smov 8   ;;  %vm426_vm10 = vcmp.ge.f32.partialorder %v422_v35, 16.0  ;;  %vm437_vm11 = vmand %vm425_vm8, %vm433_vm5  ;;  %v931_v37 = vmov 0  }
  0x93   : > { %653 = dma.vmem_to_hbm [thread:$0]  (%p1052_p10), %s1220_s11, 2048, %s1211_s25, %s445_s26, %s929_s18, %s929_s18, %s930_s21   ;;  %vm438_vm12 = vmand %vm426_vm10, %vm434_vm7 }
  0x94   : > { %s642_s4 = sshll.u32 %s914_s15, 7  ;;  %vm440_vm13 = vmpackc.low %vm438_vm12, %vm437_vm11  ;;  %s450_s15 = scalar_lea.sflag [#allocation9], %s1115_s30 }
  0x95   : > { %vm441_vm14 = vmpackc.even %vm440_vm13, %vm439_vm9  ;;  %s1279_s26 = scalar_lea.hbm %s1330_s3, %s642_s4  ;;  %s832_s6 = scalar_lea.vmem %s1269_s8, 128 }
  0x96   : > { %v442_v38 = vsel %vm441_vm14, 16843009, %v931_v37  ;;  %p833_p12 = scmp.ne.s32.totalorder %s1269_s8, %s832_s6  ;;  %s932_s19 = smov [#allocation8]  }
  0x97   : > { %443 = vst [vmem:[%s1231_s7] sm:$0xff] %v442_v38  ;;  %s836_s29 = sshll.u32 %s932_s19, 4  ;;  %s837_s29 = int_to_ptr.vmem [resolvable:$false] %s836_s29 }
  0x98   : > { %p834_p11 = pnand %p833_p12, %p1052_p10  ;;  %s838_s10 = scalar_lea.vmem %s837_s29, 256 }
  0x99   : > { %p839_p5 = scmp.lt.s32.totalorder %s1269_s8, %s837_s29  ;;  %p840_p9 = scmp.lt.s32.totalorder %s838_s10, %s832_s6 }
  0x9a   : > { %p835_p0 = pneg %p834_p11 }
  0x9b   : > { %p841_p1 = por %p840_p9, %p839_p5 }
  0x9d   : > { %p842_p2 = pnand %p841_p1, %p835_p0 }
  0x9f   : > { %845 = shalt.err (!%p842_p2)
}
  0xa0   : > { %s846_s30 = scalar_lea.hbm %s1279_s26, 128  ;;  %s850_s22 = scalar_lea.hbm %s1330_s3, 256 }
  0xa1   : > { %p847_p3 = scmp.ne.s32.totalorder %s1279_s26, %s846_s30  ;;  %p851_p4 = scmp.lt.u32.totalorder %s1279_s26, %s1330_s3 }
  0xa2   : > { %p852_p6 = scmp.lt.u32.totalorder %s850_s22, %s846_s30  ;;  %p854_p12 = scmp.lt.u32.totalorder %s846_s30, %s1279_s26 }
  0xa3   : > { %p848_p7 = pnand %p847_p3, %p1052_p10 }
  0xa4   : > { %p853_p8 = por %p852_p6, %p851_p4 }
  0xa5   : > { %p849_p13 = pneg %p848_p7 }
  0xa6   : > { %p855_p11 = por %p854_p12, %p853_p8 }
  0xa8   : > { %p856_p0 = pnand %p855_p11, %p849_p13 }
  0xaa   : > { %859 = shalt.err (!%p856_p0)
}
  0xab   : > { %654 = dma.vmem_to_hbm [thread:$0]  (%p1052_p10), %s1269_s8, 128, %s1279_s26, %s450_s15  }
  0xac PF: > { %s494_s18 = sand.u32 1, %s902_s12   ;;  %p1352_p5 = scmp.ne.s32.totalorder %s1338_s23, 0 }
  0xad   : > { %p1353_p9 = scmp.ge.s32.totalorder %s922_s17, 2  ;;  %s495_s21 = scalar_lea.sflag [#allocation4], %s494_s18 }
  0xaf   : > { %p666_p1 = pnand %p1353_p9, %p1352_p5 }
  0xb1   : > { %893 = dma.done.wait (!%p666_p1), %s495_s21, 2048  }
  0xb2   : > { %895 = vsyncadd (!%p666_p1), %s495_s21, 4294965248  ;;  %s504_s4 = scalar_lea.sflag [#allocation9], %s494_s18 }
  0xb3   : > { %897 = dma.done.wait (!%p666_p1), %s504_s4, 128  }
  0xb4   : > { %899 = vsyncadd (!%p666_p1), %s504_s4, 4294967168  ;;  %s24_s17 = sadd.s32 1, %s922_s17   ;;  %s1354_s12 = smov %s906_s13 }
  0xb5   : > { %p21_p2 = scmp.ge.s32.totalorder %s24_s17, 4   ;;  %s1355_s13 = smov %s910_s14 }
  0xb6   : > { %s1356_s14 = smov %s1061_s5  ;;  %s1357_s15 = smov %s918_s16 }
  0xb7   : > { %s1358_s16 = smov %s1360_s28  ;;  %23 = sbr.rel (!%p21_p2) target bundleno = 9 (0x9), region = 99 }
  0xbe   :  { %509 = vsyncpa [#allocation3], 1 }
  0xbf   :  { %511 = vsyncpa [#allocation3 + $0x1], 1 }
  0xc0   :  { %512 = vsyncpa [#allocation6], 1 }
  0xc1   :  { %514 = vsyncpa [#allocation6 + $0x1], 1 }
  0xc2   :  { %515 = vsyncpa [#allocation4], 1 }
  0xc3   :  { %517 = vsyncpa [#allocation4 + $0x1], 1 }
  0xc4   :  { %518 = vsyncpa [#allocation9], 1 }
  0xc5   :  { %520 = vsyncpa [#allocation9 + $0x1], 1 }

</bundles_post_ra>
